<compile_context>
chip_gen: v5e
topology: v5e:2x2
jax: 0.10.0
libtpu: 0.0.40
codegen_flags: <defaults>
</compile_context>

<pallas_src>
import functools

import jax
import jax.numpy as jnp
import numpy as np
from jax import lax
from jax.experimental import pallas as pl
from jax.experimental.pallas import tpu as pltpu

_DN = (((1,), (0,)), ((), ()))          # standard (M,K)x(K,N) contraction


# ---------------------------------------------------------------------------
# Per-generation budgets
# ---------------------------------------------------------------------------
def _vmem_limit_bytes():
    cap = 128 << 20
    try:
        info = pltpu.get_tpu_info()
        cap = int(getattr(info, "vmem_capacity_bytes", cap))
    except Exception:
        pass
    # v5e/v6e (128 MiB VMEM) -> 64 MiB scoped limit; v7x (64 MiB) -> 32 MiB.
    return int(min(max(cap // 2, 32 << 20), 96 << 20))


# ---------------------------------------------------------------------------
# Kernel 1: global average pool over spatial + L2 normalize over channels,
# fused for student and teacher.  in: (tb, C, HW) blocks, out: (tb, C) f32.
# ---------------------------------------------------------------------------
def pool_norm_kernel(xs_ref, xt_ref, os_ref, ot_ref, *, inv_hw):
    def pool_norm(x):
        x = x.astype(jnp.float32)                      # upcast in-kernel
        pooled = jnp.sum(x, axis=-1) * inv_hw          # adaptive_avg_pool2d(., 1)
        sumsq = jnp.sum(pooled * pooled, axis=-1, keepdims=True)
        # F.normalize(p=2, eps=1e-12): x / max(||x||, eps) == x * rsqrt(max(ss, eps^2))
        return pooled * lax.rsqrt(jnp.maximum(sumsq, 1e-24))

    os_ref[...] = pool_norm(xs_ref[...])
    ot_ref[...] = pool_norm(xt_ref[...])


def _pick_pool_tile(batch, row_bytes, budget_bytes):
    """Largest batch-tile (multiple of 8, dividing batch) within the budget."""
    tb = min(batch, max(1, budget_bytes // max(row_bytes, 1)))
    if tb >= batch:
        return batch
    tb = (tb // 8) * 8
    while tb >= 8 and batch % tb:
        tb -= 8
    return batch if tb < 8 else tb


# ---------------------------------------------------------------------------
# Kernel 2: SmoothAP loss.  One grid step handles `gpb` classes so the merged
# matmul LHS has M = gpb*group rows (MXU-friendly).  Only (query, positive)
# pairs inside a class contribute; the k == j mask terms are relu(0) == 0.
# ---------------------------------------------------------------------------
def smooth_ap_kernel(fg_ref, fgt_ref, fallT_ref, o_ref, *scratch,
                     gpb, group, b2, jq, kb, inv_norm):
    chunked = len(scratch) > 0

    lhs = fg_ref[0]                                            # (rows, C) bf16
    # one merged matmul against the full (C, b2) retrieval matrix (bf16 on MXU)
    sim_all = lax.dot_general(lhs, fallT_ref[...], _DN,
                              preferred_element_type=jnp.float32)   # (rows, b2)
    if chunked:
        sim_scr, sp_scr = scratch
        sim_scr[...] = sim_all

    for gi in range(gpb):                                      # static unroll
        row0 = gi * group
        lhs_g = fg_ref[0, pl.ds(row0, group), :]               # (group, C) bf16
        sp = lax.dot_general(lhs_g, fgt_ref[gi], _DN,
                             preferred_element_type=jnp.float32)    # (group, group)

        if not chunked:
            # small problem: consume the dot results directly (no store/reload)
            base = sp[:, :, None]
            pos_rk = jnp.sum(jnp.maximum(sp[:, None, :] - base, 0.0), axis=-1) + 1.0
            sa = sim_all[row0:row0 + group, :]
            all_rk = jnp.sum(jnp.maximum(sa[:, None, :] - base, 0.0), axis=-1) + 1.0
            r = pl.reciprocal(all_rk, approx=True)
            r = r * (2.0 - all_rk * r)                         # one Newton step
            total = jnp.sum(jnp.sum(pos_rk * r, axis=-1, keepdims=True),
                            axis=0, keepdims=True)
        else:
            sp_scr[...] = sp

            def q_body(qc, acc, row0=row0):
                q0 = pl.multiple_of(qc * jq, jq)
                spq = sp_scr[pl.ds(q0, jq), :]                  # (jq, group)
                base = spq[:, :, None]
                pos_rk = jnp.sum(jnp.maximum(spq[:, None, :] - base, 0.0),
                                 axis=-1) + 1.0

                def k_body(kc, a):
                    k0 = pl.multiple_of(kc * kb, kb)
                    sa = sim_scr[pl.ds(row0 + q0, jq), pl.ds(k0, kb)]
                    return a + jnp.sum(jnp.maximum(sa[:, None, :] - base, 0.0),
                                       axis=-1)

                all_rk = lax.fori_loop(0, b2 // kb, k_body,
                                       jnp.zeros((jq, group), jnp.float32)) + 1.0
                r = pl.reciprocal(all_rk, approx=True)
                r = r * (2.0 - all_rk * r)
                part = jnp.sum(jnp.sum(pos_rk * r, axis=-1, keepdims=True),
                               axis=0, keepdims=True)
                return acc + part

            total = lax.fori_loop(0, group // jq, q_body,
                                  jnp.zeros((1, 1), jnp.float32))

        o_ref[gi] = total * inv_norm                            # this class's AP share


def _pick_ranking_chunks(group, b2, budget_bytes=512 << 10):
    """Chunk sizes so the live (jq, group, kb) f32 temp stays near-vreg-resident."""
    jq = 8 if (group > 8 and group % 8 == 0) else group
    kb = b2
    per_kb_bytes = jq * group * 4
    if b2 % 128 == 0 and per_kb_bytes * b2 > budget_bytes:
        kb = min(b2, max(128, (budget_bytes // per_kb_bytes) // 128 * 128))
        while b2 % kb:
            kb -= 128
    return jq, kb


def _pick_groups_per_step(num_id, group, b2, target_rows=256, unroll_cap=32,
                          sim_budget_bytes=4 << 20):
    """Classes per grid step: M-dim near the MXU width, modest unroll/VMEM."""
    divisors = [d for d in range(1, num_id + 1) if num_id % d == 0]
    ok = [d for d in divisors
          if d <= unroll_cap
          and d * group <= max(target_rows, group)
          and d * group * b2 * 4 <= max(sim_budget_bytes, group * b2 * 4)]
    gpb = max(ok) if ok else 1
    # keep >= 2 grid steps when possible so the parallel axis spans both v7x TCs
    if num_id // gpb < 2:
        smaller = [d for d in ok if num_id // d >= 2]
        if smaller:
            gpb = max(smaller)
    return gpb


# ---------------------------------------------------------------------------
# Wrapper
# ---------------------------------------------------------------------------
def apkda_forward(outputs, targets, *, batch_size, num_id, feat_dims):
    assert batch_size % num_id == 0
    per_num = batch_size // num_id
    B, C, H, W = outputs.shape
    assert B == batch_size and C == feat_dims
    hw = H * W
    vmem_limit = _vmem_limit_bytes()

    # no wrapper-side f32 cast of the big activations (kernel upcasts)
    x_s = outputs.reshape(B, C, hw)
    x_t = targets.reshape(B, C, hw)

    # ---- fused, pipelined pooling + L2 normalize (student & teacher) ----
    tb = _pick_pool_tile(B, C * hw * x_s.dtype.itemsize, vmem_limit // 8)
    s_f, t_f = pl.pallas_call(
        functools.partial(pool_norm_kernel, inv_hw=1.0 / hw),
        out_shape=(jax.ShapeDtypeStruct((B, C), jnp.float32),
                   jax.ShapeDtypeStruct((B, C), jnp.float32)),
        grid=(B // tb,),
        in_specs=[pl.BlockSpec((tb, C, hw), lambda i: (i, 0, 0)),
                  pl.BlockSpec((tb, C, hw), lambda i: (i, 0, 0))],
        out_specs=(pl.BlockSpec((tb, C), lambda i: (i, 0)),
                   pl.BlockSpec((tb, C), lambda i: (i, 0))),
        compiler_params=pltpu.CompilerParams(
            dimension_semantics=("parallel",),
            vmem_limit_bytes=vmem_limit),
    )(x_s, x_t)

    b2 = 2 * batch_size
    group = 2 * per_num

    # Tiny wrapper-side layout plumbing (all on (b2, C)-sized arrays):
    #  * per-class [student ; teacher] member blocks (same rows as the reference's
    #    interleaved `f`), cast once to bf16 so every MXU operand is bf16,
    #  * (C, b2) pre-transposed retrieval matrix -> standard contraction,
    #  * per-class (C, group) transposed blocks for the positives matmul.
    s_g = s_f.reshape(num_id, per_num, C)
    t_g = t_f.reshape(num_id, per_num, C)
    f_g = jnp.concatenate([s_g, t_g], axis=1).astype(jnp.bfloat16)   # (num_id, group, C)
    f_all_t = jnp.transpose(f_g.reshape(b2, C), (1, 0))              # (C, b2) bf16
    f_g_t = jnp.transpose(f_g, (0, 2, 1))                            # (num_id, C, group)

    gpb = _pick_groups_per_step(num_id, group, b2)
    steps = num_id // gpb
    rows = gpb * group
    f_lhs = f_g.reshape(steps, rows, C)                              # merged LHS blocks

    jq, kb = _pick_ranking_chunks(group, b2)
    chunked = (jq < group) or (kb < b2)
    scratch = ([pltpu.VMEM((rows, b2), jnp.float32),
                pltpu.VMEM((group, group), jnp.float32)] if chunked else [])

    ap_parts = pl.pallas_call(
        functools.partial(smooth_ap_kernel, gpb=gpb, group=group, b2=b2,
                          jq=jq, kb=kb, inv_norm=1.0 / (group * b2)),
        out_shape=jax.ShapeDtypeStruct((num_id, 1, 1), jnp.float32),
        grid=(steps,),
        in_specs=[pl.BlockSpec((1, rows, C), lambda i: (i, 0, 0)),     # this step's member rows
                  pl.BlockSpec((gpb, C, group), lambda i: (i, 0, 0)),  # their transposed blocks
                  pl.BlockSpec((C, b2), lambda i: (0, 0))],            # full retrieval matrix (bf16)
        out_specs=pl.BlockSpec((gpb, 1, 1), lambda i: (i, 0, 0)),
        scratch_shapes=scratch,
        compiler_params=pltpu.CompilerParams(
            dimension_semantics=("parallel",),
            vmem_limit_bytes=vmem_limit),
    )(f_lhs, f_g_t, f_all_t)

    # tiny scalar finalize in plain JAX keeps the per-class grid axis parallel
    return (1.0 - jnp.sum(ap_parts)).reshape(1)   # matches torch: shape (1,)


# ---------------------------------------------------------------------------
# Pure-JAX reference (mirrors the PyTorch code path) for verification
# ---------------------------------------------------------------------------
def apkda_reference(outputs, targets, *, batch_size, num_id, feat_dims):
    def pool_norm(x):
        p = x.mean(axis=(2, 3))
        n = jnp.sqrt(jnp.sum(p * p, axis=1, keepdims=True))
        return p / jnp.maximum(n, 1e-12)

    s_f = pool_norm(outputs.astype(jnp.float32))
    t_f = pool_norm(targets.astype(jnp.float32))
    per = batch_size // num_id
    f = jnp.stack(
        [s_f.reshape(num_id, per, -1), t_f.reshape(num_id, per, -1)], axis=1
    ).reshape(2 * batch_size, -1)

    b2 = 2 * batch_size
    group = b2 // num_id
    sim_all = f @ f.T
    mask = 1.0 - jnp.eye(b2)
    diff = sim_all[:, None, :] - sim_all[:, :, None]
    sim_all_rk = jnp.sum(jnp.maximum(diff, 0.0) * mask[None], axis=-1) + 1.0

    xs = f.reshape(num_id, group, -1)
    sim_pos = jnp.einsum("gac,gbc->gab", xs, xs)
    pdiff = sim_pos[:, :, None, :] - sim_pos[:, :, :, None]
    pmask = 1.0 - jnp.eye(group)
    sim_pos_rk = jnp.sum(jnp.maximum(pdiff, 0.0) * pmask[None, None], axis=-1) + 1.0

    ap = 0.0
    for ind in range(num_id):
        blk = sim_all_rk[ind * group:(ind + 1) * group, ind * group:(ind + 1) * group]
        ap = ap + jnp.sum(sim_pos_rk[ind] / blk) / group / b2
    return jnp.reshape(1.0 - ap, (1,))


if __name__ == "__main__":
    batch_size, num_id, feat_dims, H, W = 4, 2, 16, 8, 8   # APKDA has no learned params
    key = jax.random.PRNGKey(0)
    k1, k2 = jax.random.split(key)
    outputs = jax.random.normal(k1, (batch_size, feat_dims, H, W), jnp.float32)
    targets = jax.random.normal(k2, (batch_size, feat_dims, H, W), jnp.float32)

    loss = apkda_forward(
        outputs, targets, batch_size=batch_size, num_id=num_id, feat_dims=feat_dims
    )
    loss = jax.block_until_ready(loss)

    ref = apkda_reference(
        outputs, targets, batch_size=batch_size, num_id=num_id, feat_dims=feat_dims
    )
    # tolerance absorbs the bf16 MXU operands (the reference is full f32);
    # the EUP reciprocal is Newton-refined so division error is negligible.
    assert np.allclose(np.asarray(loss), np.asarray(ref), rtol=1e-2, atol=1e-2), (
        loss, ref)
    print("KERNEL_OK")
</pallas_src>

<mosaic_0001>
module attributes {stable_mosaic.version = 11 : i64} {
  func.func @pool_norm_kernel(%arg0: i32, %arg1: memref<4x16x64xf32, #tpu.memory_space<vmem>>, %arg2: memref<4x16x64xf32, #tpu.memory_space<vmem>>, %arg3: memref<4x16xf32, #tpu.memory_space<vmem>>, %arg4: memref<4x16xf32, #tpu.memory_space<vmem>>) attributes {dimension_semantics = [#tpu.dimension_semantics<parallel>], iteration_bounds = array<i64: 1>, scalar_prefetch = 0 : i64, scratch_operands = 0 : i64, tpu.core_type = #tpu.core_type<tc>, window_params = [{transform_indices = @transform_0, window_bounds = array<i64: 4, 16, 64>}, {transform_indices = @transform_1, window_bounds = array<i64: 4, 16, 64>}, {transform_indices = @transform_2, window_bounds = array<i64: 4, 16>}, {transform_indices = @transform_3, window_bounds = array<i64: 4, 16>}]} {
    %c0 = arith.constant 0 : index
    %c0_0 = arith.constant 0 : index
    %c0_1 = arith.constant 0 : index
    %0 = vector.load %arg1[%c0, %c0_0, %c0_1] : memref<4x16x64xf32, #tpu.memory_space<vmem>>, vector<4x16x64xf32>
    %cst = arith.constant dense<0.000000e+00> : vector<4x16xf32>
    %1 = vector.multi_reduction <add>, %0, %cst [2] : vector<4x16x64xf32> to vector<4x16xf32>
    %cst_2 = arith.constant 1.562500e-02 : f32
    %2 = vector.broadcast %cst_2 : f32 to vector<4x16xf32>
    %3 = arith.mulf %1, %2 : vector<4x16xf32>
    %4 = arith.mulf %3, %3 : vector<4x16xf32>
    %cst_3 = arith.constant dense<0.000000e+00> : vector<4xf32>
    %5 = vector.multi_reduction <add>, %4, %cst_3 [1] : vector<4x16xf32> to vector<4xf32>
    %6 = vector.shape_cast %5 : vector<4xf32> to vector<4x1xf32>
    %cst_4 = arith.constant 1.000000e-24 : f32
    %7 = vector.broadcast %cst_4 : f32 to vector<4x1xf32>
    %8 = arith.maximumf %6, %7 : vector<4x1xf32>
    %9 = math.rsqrt %8 : vector<4x1xf32>
    %10 = vector.broadcast %9 : vector<4x1xf32> to vector<4x16xf32>
    %11 = arith.mulf %3, %10 : vector<4x16xf32>
    %c0_5 = arith.constant 0 : index
    %c0_6 = arith.constant 0 : index
    %12 = vector.load %arg3[%c0_5, %c0_6] : memref<4x16xf32, #tpu.memory_space<vmem>>, vector<4x16xf32>
    tpu.vector_store %arg3[%c0_5, %c0_6], %11 {strides = array<i32>} : memref<4x16xf32, #tpu.memory_space<vmem>>, vector<4x16xf32>,
    %c0_7 = arith.constant 0 : index
    %c0_8 = arith.constant 0 : index
    %c0_9 = arith.constant 0 : index
    %13 = vector.load %arg2[%c0_7, %c0_8, %c0_9] : memref<4x16x64xf32, #tpu.memory_space<vmem>>, vector<4x16x64xf32>
    %cst_10 = arith.constant dense<0.000000e+00> : vector<4x16xf32>
    %14 = vector.multi_reduction <add>, %13, %cst_10 [2] : vector<4x16x64xf32> to vector<4x16xf32>
    %cst_11 = arith.constant 1.562500e-02 : f32
    %15 = vector.broadcast %cst_11 : f32 to vector<4x16xf32>
    %16 = arith.mulf %14, %15 : vector<4x16xf32>
    %17 = arith.mulf %16, %16 : vector<4x16xf32>
    %cst_12 = arith.constant dense<0.000000e+00> : vector<4xf32>
    %18 = vector.multi_reduction <add>, %17, %cst_12 [1] : vector<4x16xf32> to vector<4xf32>
    %19 = vector.shape_cast %18 : vector<4xf32> to vector<4x1xf32>
    %cst_13 = arith.constant 1.000000e-24 : f32
    %20 = vector.broadcast %cst_13 : f32 to vector<4x1xf32>
    %21 = arith.maximumf %19, %20 : vector<4x1xf32>
    %22 = math.rsqrt %21 : vector<4x1xf32>
    %23 = vector.broadcast %22 : vector<4x1xf32> to vector<4x16xf32>
    %24 = arith.mulf %16, %23 : vector<4x16xf32>
    %c0_14 = arith.constant 0 : index
    %c0_15 = arith.constant 0 : index
    %25 = vector.load %arg4[%c0_14, %c0_15] : memref<4x16xf32, #tpu.memory_space<vmem>>, vector<4x16xf32>
    tpu.vector_store %arg4[%c0_14, %c0_15], %24 {strides = array<i32>} : memref<4x16xf32, #tpu.memory_space<vmem>>, vector<4x16xf32>,
    return
  }
  func.func @transform_0(%arg0: i32) -> (i32, i32, i32) {
    %c0_i32 = arith.constant 0 : i32
    %c0_i32_0 = arith.constant 0 : i32
    %c0_i32_1 = arith.constant 0 : i32
    return %arg0, %c0_i32, %c0_i32_0 : i32, i32, i32
  }
  func.func @transform_1(%arg0: i32) -> (i32, i32, i32) {
    %c0_i32 = arith.constant 0 : i32
    %c0_i32_0 = arith.constant 0 : i32
    %c0_i32_1 = arith.constant 0 : i32
    return %arg0, %c0_i32, %c0_i32_0 : i32, i32, i32
  }
  func.func @transform_2(%arg0: i32) -> (i32, i32) {
    %c0_i32 = arith.constant 0 : i32
    %c0_i32_0 = arith.constant 0 : i32
    return %arg0, %c0_i32 : i32, i32
  }
  func.func @transform_3(%arg0: i32) -> (i32, i32) {
    %c0_i32 = arith.constant 0 : i32
    %c0_i32_0 = arith.constant 0 : i32
    return %arg0, %c0_i32 : i32, i32
  }
}

</mosaic_0001>

<bundles_post_ra>
// kernel: tpu_custom_call.1
= control target key start
LH: loop header
LB: loop body
LE: loop exit
PB: predicated region body
PF: predicated region fallthrough
CT: control target
= control target key end

     0   :  { %9 = vsyncpa [#allocation3], 0  ;;  %s716_s0 = inlined_call_operand.hbm [shape: f32[4,16,64], index: 0, kind: input, shape index: {}]   ;;  %s717_s1 = inlined_call_operand.hbm [shape: f32[4,16,64], index: 1, kind: input, shape index: {}]   ;;  %s718_s2 = inlined_call_operand.hbm [shape: f32[4,16], index: 2, kind: output, shape index: {0}]   ;;  %s719_s3 = inlined_call_operand.hbm [shape: f32[4,16], index: 3, kind: output, shape index: {1}]  }
   0x1   :  { %10 = vsyncpa [#allocation6], 0 }
   0x2   :  { %11 = vsyncpa [#allocation4], 0 }
   0x3   :  { %12 = vsyncpa [#allocation9], 0  ;;  %s17_s14 = sshll.u32 %s716_s0, 4  ;;  %s512_s15 = smov [#allocation2]   ;;  %s18_s14 = int_to_ptr.hbm [resolvable:$true] %s17_s14 }
   0x4   :  { %s19_s16 = sshll.u32 %s512_s15, 4  ;;  %s30_s19 = sshll.u32 %s717_s1, 4  ;;  %s20_s16 = int_to_ptr.vmem [resolvable:$true] %s19_s16  ;;  %s31_s19 = int_to_ptr.hbm [resolvable:$true] %s30_s19 }
   0x5   :  { %s513_s20 = smov 128   ;;  %s514_s21 = smov 8  }
   0x6   :  { %25 = dma.hbm_to_vmem [thread:$0]  %s18_s14, 1024, %s20_s16, [#allocation3], %s513_s20, %s513_s20, %s514_s21  }
   0x7   :  { %s515_s22 = smov [#allocation5]  }
   0x8   :  { %s32_s23 = sshll.u32 %s515_s22, 4  ;;  %s33_s23 = int_to_ptr.vmem [resolvable:$true] %s32_s23 }
   0x9   :  { %38 = dma.hbm_to_vmem [thread:$0]  %s31_s19, 1024, %s33_s23, [#allocation6], %s513_s20, %s513_s20, %s514_s21  }
   0xa   :  { %504 = dma.done.wait [#allocation3], 1024  }
   0xb   :  { %505 = vsyncadd [#allocation3], 4294966272 }
   0xc   :  { %506 = dma.done.wait [#allocation6], 1024  }
   0xd   :  { %507 = vsyncadd [#allocation6], 4294966272  ;;  %vm55_vm0 = vcmask 523264   ;;  %v51_v0 = vld [vmem:[#allocation2 + $0x20] sm:$0xff]  ;;  %v49_v1 = vld [vmem:[#allocation2 + $0x10] sm:$0xff]  ;;  %v104_v41 = vlaneseq  ;;  %vm109_vm1 = vcmask 130112  }
   0xe   :  { %v47_v2 = vld [vmem:[#allocation2] sm:$0xff]  ;;  %v68_v3 = vsel %vm55_vm0, %v51_v0, 0.0  ;;  %v62_v4 = vsel %vm55_vm0, %v49_v1, 0.0  ;;  %v52_v6 = vld [vmem:[#allocation2 + $0x28] sm:$0xff]  ;;  %v50_v7 = vld [vmem:[#allocation2 + $0x18] sm:$0xff]  ;;  %vm120_vm2 = vcmask 1041409  }
   0xf   :  { %v56_v5 = vsel %vm55_vm0, %v47_v2, 0.0  ;;  %69 = vadd.xlane.f32.xlu2 %v68_v3  ;;  %63 = vadd.xlane.f32.xlu1 %v62_v4  ;;  %v48_v8 = vld [vmem:[#allocation2 + $0x8] sm:$0xff]  ;;  %v71_v9 = vsel %vm55_vm0, %v52_v6, 0.0  ;;  %v65_v10 = vsel %vm55_vm0, %v50_v7, 0.0  ;;  %v210_v12 = vld [vmem:[#allocation5 + $0x10] sm:$0xff]  ;;  %v208_v14 = vld [vmem:[#allocation5] sm:$0xff] }
  0x10   :  { %57 = vadd.xlane.f32.xlu0 %v56_v5  ;;  %v59_v11 = vsel %vm55_vm0, %v48_v8, 0.0  ;;  %v209_v13 = vld [vmem:[#allocation5 + $0x8] sm:$0xff]  ;;  %v222_v15 = vsel %vm55_vm0, %v210_v12, 0.0  ;;  %v216_v17 = vsel %vm55_vm0, %v208_v14, 0.0  ;;  %v212_v19 = vld [vmem:[#allocation5 + $0x20] sm:$0xff]  ;;  %v211_v20 = vld [vmem:[#allocation5 + $0x18] sm:$0xff] }
  0x11   :  { %v219_v16 = vsel %vm55_vm0, %v209_v13, 0.0  ;;  %v213_v18 = vld [vmem:[#allocation5 + $0x28] sm:$0xff]  ;;  %v228_v22 = vsel %vm55_vm0, %v212_v19, 0.0  ;;  %v225_v23 = vsel %vm55_vm0, %v211_v20, 0.0  ;;  %v54_v24 = vld [vmem:[#allocation2 + $0x38] sm:$0xff]  ;;  %v214_v25 = vld [vmem:[#allocation5 + $0x30] sm:$0xff] }
  0x12   :  { %v231_v21 = vsel %vm55_vm0, %v213_v18, 0.0  ;;  %v53_v26 = vld [vmem:[#allocation2 + $0x30] sm:$0xff]  ;;  %v77_v27 = vsel %vm55_vm0, %v54_v24, 0.0  ;;  %v234_v28 = vsel %vm55_vm0, %v214_v25, 0.0  ;;  %v215_v30 = vld [vmem:[#allocation5 + $0x38] sm:$0xff]  ;;  %v565_v44 = vand.u32 127, %v104_v41 }
  0x13   :  { %v74_v29 = vsel %vm55_vm0, %v53_v26, 0.0  ;;  %v237_v31 = vsel %vm55_vm0, %v215_v30, 0.0  ;;  %vm122_vm3 = vcmask 1042434   ;;  %vm124_vm4 = vcmask 1043459   ;;  %s517_s0 = smov [#allocation7]   ;;  %s367_s26 = sshll.u32 %s718_s2, 4  ;;  %s368_s26 = int_to_ptr.hbm [resolvable:$true] %s367_s26 }
  0x14   :  { %v576_v49 = vadd.s32 4294967288, %v565_v44  ;;  %vm127_vm5 = vcmask 125952   ;;  %s365_s1 = sshll.u32 %s517_s0, 4  ;;  %s518_s2 = smov [#allocation8]   ;;  %s366_s1 = int_to_ptr.vmem [resolvable:$true] %s365_s1 }
  0x15   :  { %s376_s27 = sshll.u32 %s518_s2, 4  ;;  %s378_s30 = sshll.u32 %s719_s3, 4  ;;  %s377_s27 = int_to_ptr.vmem [resolvable:$true] %s376_s27  ;;  %s379_s30 = int_to_ptr.hbm [resolvable:$true] %s378_s30 }
  0x17   :  { %72 = vadd.xlane.f32.xlu2 %v71_v9  ;;  %66 = vadd.xlane.f32.xlu1 %v65_v10 }
  0x18   :  { %60 = vadd.xlane.f32.xlu0 %v59_v11 }
  0x1f   :  { %223 = vadd.xlane.f32.xlu2 %v222_v15  ;;  %220 = vadd.xlane.f32.xlu1 %v219_v16 }
  0x20   :  { %217 = vadd.xlane.f32.xlu0 %v216_v17 }
  0x27   :  { %232 = vadd.xlane.f32.xlu2 %v231_v21  ;;  %229 = vadd.xlane.f32.xlu1 %v228_v22 }
  0x28   :  { %226 = vadd.xlane.f32.xlu0 %v225_v23 }
  0x2f   :  { %78 = vadd.xlane.f32.xlu1 %v77_v27  ;;  %235 = vadd.xlane.f32.xlu2 %v234_v28 }
  0x30   :  { %75 = vadd.xlane.f32.xlu0 %v74_v29 }
  0x38   :  { %238 = vadd.xlane.f32.xlu0 %v237_v31 }
  0x82   :  { %v70_v32 = vpop.xlane.xlu2 %69  ;;  %v64_v33 = vpop.xlane.xlu1 %63 }
  0x83   :  { %v58_v34 = vpop.xlane.xlu0 %57  ;;  %v567_v45 = vmul.f32 0.015625, %v64_v33  ;;  %v571_v47 = vmul.f32 0.015625, %v70_v32 }
  0x84   :  { %v569_v46 = vmul.f32 0.015625, %v58_v34 }
  0x85   :  { %v90_v55 = vmul.f32 %v567_v45, %v567_v45  ;;  %v92_v57 = vmul.f32 %v571_v47, %v571_v47 }
  0x86   :  { %v88_v56 = vmul.f32 %v569_v46, %v569_v46 }
  0x87   :  { %v111_v61 = vperm.slane %v90_v55, %v565_v44  ;;  %v114_v1 = vperm.slane %v92_v57, %v565_v44 }
  0x88   :  { %v106_v62 = vperm.slane %v88_v56, %v565_v44 }
  0x8a   :  { %v73_v35 = vpop.xlane.xlu2 %72  ;;  %v67_v36 = vpop.xlane.xlu1 %66 }
  0x8b   :  { %v61_v37 = vpop.xlane.xlu0 %60  ;;  %v561_v42 = vmul.f32 0.015625, %v67_v36  ;;  %v573_v48 = vmul.f32 0.015625, %v73_v35 }
  0x8c   :  { %v563_v43 = vmul.f32 0.015625, %v61_v37 }
  0x8d   :  { %v91_v50 = vmul.f32 %v561_v42, %v561_v42  ;;  %v93_v58 = vmul.f32 %v573_v48, %v573_v48 }
  0x8e   :  { %v89_v51 = vmul.f32 %v563_v43, %v563_v43 }
  0x8f   :  { %v112_v59 = vperm.slane %v91_v50, %v576_v49  ;;  %v115_v2 = vperm.slane %v93_v58, %v576_v49 }
  0x90   :  { %v108_v60 = vperm.slane %v89_v51, %v576_v49 }
  0x91   :  { %v113_v7 = vsel %vm109_vm1, %v112_v59, %v111_v61  ;;  %v116_v17 = vsel %vm109_vm1, %v115_v2, %v114_v1  ;;  %v516_v59 = vmov 0  }
  0x92   :  { %v224_v38 = vpop.xlane.xlu2 %223  ;;  %v221_v39 = vpop.xlane.xlu1 %220  ;;  %v110_v6 = vsel %vm109_vm1, %v108_v60, %v106_v62  ;;  %403 = vset.pattern.permute.xlu1 %v516_v59  ;;  %402 = vset.pattern.permute.xlu0 %v516_v59 }
  0x93   :  { %v218_v40 = vpop.xlane.xlu0 %217  ;;  %v594_v63 = vmul.f32 0.015625, %v224_v38  ;;  %v600_v3 = vmul.f32 0.015625, %v221_v39  ;;  %v121_v18 = vsel %vm120_vm2, %v113_v7, %v110_v6  ;;  %401 = vset.pattern.permute.xlu2 %v516_v59 }
  0x94   :  { %v602_v4 = vmul.f32 0.015625, %v218_v40  ;;  %v123_v29 = vsel %vm122_vm3, %v116_v17, %v121_v18 }
  0x95   :  { %v250_v13 = vmul.f32 %v594_v63, %v594_v63  ;;  %v249_v19 = vmul.f32 %v600_v3, %v600_v3 }
  0x96   :  { %v248_v20 = vmul.f32 %v602_v4, %v602_v4 }
  0x97   :  { %v267_v26 = vperm.slane %v250_v13, %v565_v44  ;;  %v265_v30 = vperm.slane %v249_v19, %v576_v49 }
  0x98   :  { %v264_v31 = vperm.slane %v248_v20, %v565_v44 }
  0x9a   :  { %v230_v52 = vpop.xlane.xlu1 %229  ;;  %v233_v53 = vpop.xlane.xlu2 %232  ;;  %v266_v51 = vsel %vm109_vm1, %v265_v30, %v264_v31 }
  0x9b   :  { %v227_v54 = vpop.xlane.xlu0 %226  ;;  %v606_v8 = vmul.f32 0.015625, %v233_v53  ;;  %v608_v9 = vmul.f32 0.015625, %v230_v52 }
  0x9c   :  { %v596_v0 = vmul.f32 0.015625, %v227_v54 }
  0x9d   :  { %v253_v23 = vmul.f32 %v606_v8, %v606_v8  ;;  %v252_v24 = vmul.f32 %v608_v9, %v608_v9 }
  0x9e   :  { %v251_v14 = vmul.f32 %v596_v0, %v596_v0 }
  0x9f   :  { %v271_v34 = vperm.slane %v253_v23, %v576_v49  ;;  %v270_v35 = vperm.slane %v252_v24, %v565_v44 }
  0xa0   :  { %v268_v27 = vperm.slane %v251_v14, %v576_v49 }
  0xa1   :  { %v272_v52 = vsel %vm109_vm1, %v271_v34, %v270_v35 }
  0xa2   :  { %v79_v5 = vpop.xlane.xlu1 %78  ;;  %v236_v12 = vpop.xlane.xlu2 %235  ;;  %v269_v40 = vsel %vm109_vm1, %v268_v27, %v267_v26 }
  0xa3   :  { %v610_v10 = vmul.f32 0.015625, %v79_v5  ;;  %v76_v11 = vpop.xlane.xlu0 %75  ;;  %v628_v22 = vmul.f32 0.015625, %v236_v12  ;;  %v276_v53 = vsel %vm120_vm2, %v269_v40, %v266_v51 }
  0xa4   :  { %v616_v15 = vmul.f32 0.015625, %v76_v11  ;;  %v277_v56 = vsel %vm122_vm3, %v272_v52, %v276_v53 }
  0xa5   :  { %v95_v16 = vmul.f32 %v610_v10, %v610_v10  ;;  %v254_v32 = vmul.f32 %v628_v22, %v628_v22 }
  0xa6   :  { %v94_v21 = vmul.f32 %v616_v15, %v616_v15 }
  0xa7   :  { %v118_v25 = vperm.slane %v95_v16, %v576_v49  ;;  %v273_v41 = vperm.slane %v254_v32, %v565_v44 }
  0xa8   :  { %v117_v28 = vperm.slane %v94_v21, %v565_v44 }
  0xaa   :  { %v119_v33 = vsel %vm109_vm1, %v118_v25, %v117_v28 }
  0xab   :  { %v239_v36 = vpop.xlane.xlu0 %238  ;;  %v125_v37 = vsel %vm124_vm4, %v119_v33, %v123_v29 }
  0xac   :  { %v647_v38 = vmul.f32 0.015625, %v239_v36  ;;  %v128_v39 = vsel %vm127_vm5, %v125_v37, 0.0 }
  0xad   :  { %129 = vadd.xlane.f32.xlu1 %v128_v39 }
  0xae   :  { %v255_v50 = vmul.f32 %v647_v38, %v647_v38 }
  0xb0   :  { %v274_v54 = vperm.slane %v255_v50, %v576_v49 }
  0xb2   :  { %v275_v55 = vsel %vm109_vm1, %v274_v54, %v273_v41 }
  0xb3   :  { %v278_v57 = vsel %vm124_vm4, %v275_v55, %v277_v56 }
  0xb4   :  { %v280_v58 = vsel %vm127_vm5, %v278_v57, 0.0 }
  0xb5   :  { %281 = vadd.xlane.f32.xlu1 %v280_v58 }
 0x120   :  { %v130_v60 = vpop.xlane.xlu1 %129 }
 0x121   :  { %v131_v61 = vmax.f32 %v130_v60, 1e-24 }
 0x123   :  { %404 = vrsqrt.f32 %v131_v61  ;;  %vm138_vm7 = vweird.f32 %v131_v61 }
 0x128   :  { %v282_v62 = vpop.xlane.xlu1 %281 }
 0x129   :  { %v405_v1 = vpop.eup %404  ;;  %v283_v2 = vmax.f32 %v282_v62, 1e-24 }
 0x12a   :  { %v133_v5 = vmul.f32 %v405_v1, %v131_v61  ;;  %vm139_vm6 = vweird.f32 %v405_v1 }
 0x12b   :  { %406 = vrsqrt.f32 %v283_v2  ;;  %vm140_vm8 = vmor %vm138_vm7, %vm139_vm6  ;;  %vm290_vm10 = vweird.f32 %v283_v2 }
 0x12c   :  { %v134_v6 = vmul.f32 %v405_v1, %v133_v5 }
 0x12e   :  { %v135_v7 = vmul.f32 0.5, %v134_v6 }
 0x130   :  { %v136_v11 = vsub.f32 1.5, %v135_v7 }
 0x131   :  { %v407_v12 = vpop.eup %406 }
 0x132   :  { %v137_v13 = vmul.f32 %v405_v1, %v136_v11  ;;  %v285_v14 = vmul.f32 %v407_v12, %v283_v2  ;;  %vm291_vm9 = vweird.f32 %v407_v12 }
 0x133   :  { %vm292_vm11 = vmor %vm290_vm10, %vm291_vm9 }
 0x134   :  { %v141_v16 = vsel %vm140_vm8, %v405_v1, %v137_v13  ;;  %v286_v17 = vmul.f32 %v407_v12, %v285_v14 }
 0x135   :  { %v143_v18 = vperm.slane %v141_v16, 0  ;;  %v144_v19 = vperm.slane %v141_v16, 1  ;;  %v146_v26 = vperm.slane %v141_v16, 3 }
 0x136   :  { %v287_v20 = vmul.f32 0.5, %v286_v17 }
 0x137   :  { %v152_v21 = vmul.f32 %v143_v18, %v563_v43  ;;  %v151_v23 = vmul.f32 %v143_v18, %v569_v46  ;;  %v153_v24 = vmul.f32 %v144_v19, %v567_v45  ;;  %v158_v28 = vmul.f32 %v146_v26, %v610_v10 }
 0x138   :  { %v288_v25 = vsub.f32 1.5, %v287_v20  ;;  %v154_v29 = vmul.f32 %v144_v19, %v561_v42  ;;  %v157_v43 = vmul.f32 %v146_v26, %v616_v15  ;;  %v145_v45 = vperm.slane %v141_v16, 2 }
 0x139   :  { %171 = vperm.xlu0 %402, %v152_v21   ;;  %168 = vperm.xlu2 %401, %v151_v23  }
 0x13a   :  { %174 = vperm.xlu1 %403, %v153_v24   ;;  %v289_v27 = vmul.f32 %v407_v12, %v288_v25  ;;  %v155_v32 = vmul.f32 %v145_v45, %v571_v47  ;;  %v156_v42 = vmul.f32 %v145_v45, %v573_v48 }
 0x13c   :  { %v293_v30 = vsel %vm292_vm11, %v407_v12, %v289_v27 }
 0x13d   :  { %v296_v46 = vperm.slane %v293_v30, 1  ;;  %v295_v31 = vperm.slane %v293_v30, 0  ;;  %v297_v10 = vperm.slane %v293_v30, 2  ;;  %v298_v36 = vperm.slane %v293_v30, 3 }
 0x13f   :  { %v305_v33 = vmul.f32 %v296_v46, %v594_v63  ;;  %v304_v34 = vmul.f32 %v295_v31, %v600_v3  ;;  %v308_v15 = vmul.f32 %v297_v10, %v606_v8  ;;  %v307_v35 = vmul.f32 %v297_v10, %v608_v9 }
 0x140   :  { %v303_v47 = vmul.f32 %v295_v31, %v602_v4  ;;  %v310_v63 = vmul.f32 %v298_v36, %v647_v38  ;;  %v306_v3 = vmul.f32 %v296_v46, %v596_v0  ;;  %v309_v37 = vmul.f32 %v298_v36, %v628_v22 }
 0x141   :  { %189 = vperm.xlu0 %402, %v158_v28   ;;  %177 = vperm.xlu2 %401, %v154_v29  }
 0x142   :  { %186 = vperm.xlu1 %403, %v157_v43  }
 0x149   :  { %180 = vperm.xlu2 %401, %v155_v32   ;;  %326 = vperm.xlu0 %402, %v305_v33  }
 0x14a   :  { %323 = vperm.xlu1 %403, %v304_v34  }
 0x151   :  { %183 = vperm.xlu2 %401, %v156_v42   ;;  %335 = vperm.xlu0 %402, %v308_v15  }
 0x152   :  { %332 = vperm.xlu1 %403, %v307_v35  }
 0x159   :  { %320 = vperm.xlu2 %401, %v303_v47  }
 0x15a   :  { %341 = vperm.xlu1 %403, %v310_v63  }
 0x161   :  { %329 = vperm.xlu2 %401, %v306_v3  }
 0x169   :  { %338 = vperm.xlu2 %401, %v309_v37  }
 0x193   :  { %v169_v48 = vpop.permute.xlu2 %168 }
 0x194   :  { %v191_v38 = vperm.slane %v169_v48, %v565_v44 }
 0x19b   :  { %v178_v8 = vpop.permute.xlu2 %177 }
 0x19c   :  { %v195_v51 = vperm.slane %v178_v8, %v576_v49 }
 0x1a3   :  { %v181_v39 = vpop.permute.xlu2 %180 }
 0x1a4   :  { %v197_v53 = vperm.slane %v181_v39, %v565_v44 }
 0x1ab   :  { %v172_v9 = vpop.permute.xlu0 %171  ;;  %v184_v40 = vpop.permute.xlu2 %183 }
 0x1ac   :  { %v175_v41 = vpop.permute.xlu1 %174  ;;  %v192_v4 = vperm.slane %v172_v9, %v576_v49  ;;  %v198_v0 = vperm.slane %v184_v40, %v576_v49 }
 0x1ad   :  { %v194_v50 = vperm.slane %v175_v41, %v565_v44 }
 0x1ae   :  { %v193_v22 = vsel %vm109_vm1, %v192_v4, %v191_v38  ;;  %v199_v55 = vsel %vm109_vm1, %v198_v0, %v197_v53 }
 0x1af   :  { %v196_v52 = vsel %vm109_vm1, %v195_v51, %v194_v50 }
 0x1b0   :  { %v203_v56 = vsel %vm120_vm2, %v196_v52, %v193_v22 }
 0x1b1   :  { %v204_v62 = vsel %vm122_vm3, %v199_v55, %v203_v56 }
 0x1b3   :  { %v190_v54 = vpop.permute.xlu0 %189  ;;  %v321_v60 = vpop.permute.xlu2 %320 }
 0x1b4   :  { %v187_v57 = vpop.permute.xlu1 %186  ;;  %v201_v58 = vperm.slane %v190_v54, %v576_v49  ;;  %v343_v18 = vperm.slane %v321_v60, %v565_v44 }
 0x1b5   :  { %v200_v59 = vperm.slane %v187_v57, %v565_v44 }
 0x1b7   :  { %v202_v61 = vsel %vm109_vm1, %v201_v58, %v200_v59 }
 0x1b8   :  { %v205_v1 = vsel %vm124_vm4, %v202_v61, %v204_v62 }
 0x1b9   :  { %207 = vst.msk [vmem:[#allocation7] sm:$0xf] %vm127_vm5, %v205_v1 }
 0x1ba   :  { %370 = dma.vmem_to_hbm [thread:$0]  %s366_s1, 64, %s368_s26, [#allocation4]  }
 0x1bb   :  { %v327_v2 = vpop.permute.xlu0 %326  ;;  %v330_v6 = vpop.permute.xlu2 %329 }
 0x1bc   :  { %v324_v5 = vpop.permute.xlu1 %323  ;;  %v347_v12 = vperm.slane %v330_v6, %v576_v49  ;;  %v346_v14 = vperm.slane %v327_v2, %v565_v44 }
 0x1bd   :  { %v344_v13 = vperm.slane %v324_v5, %v576_v49 }
 0x1be   :  { %v348_v21 = vsel %vm109_vm1, %v347_v12, %v346_v14 }
 0x1bf   :  { %v345_v20 = vsel %vm109_vm1, %v344_v13, %v343_v18 }
 0x1c0   :  { %v355_v27 = vsel %vm120_vm2, %v348_v21, %v345_v20 }
 0x1c3   :  { %v336_v11 = vpop.permute.xlu0 %335  ;;  %v339_v19 = vpop.permute.xlu2 %338 }
 0x1c4   :  { %v333_v7 = vpop.permute.xlu1 %332  ;;  %v350_v17 = vperm.slane %v336_v11, %v576_v49  ;;  %v352_v25 = vperm.slane %v339_v19, %v565_v44 }
 0x1c5   :  { %v349_v16 = vperm.slane %v333_v7, %v565_v44 }
 0x1c7   :  { %v351_v23 = vsel %vm109_vm1, %v350_v17, %v349_v16 }
 0x1c8   :  { %v356_v28 = vsel %vm122_vm3, %v351_v23, %v355_v27 }
 0x1cc   :  { %v342_v24 = vpop.permute.xlu1 %341 }
 0x1cd   :  { %v353_v26 = vperm.slane %v342_v24, %v576_v49 }
 0x1cf   :  { %v354_v29 = vsel %vm109_vm1, %v353_v26, %v352_v25 }
 0x1d0   :  { %v357_v30 = vsel %vm124_vm4, %v354_v29, %v356_v28 }
 0x1d1   :  { %359 = vst.msk [vmem:[#allocation8] sm:$0xf] %vm127_vm5, %v357_v30 }
 0x1d2   :  { %381 = dma.vmem_to_hbm [thread:$0]  %s377_s27, 64, %s379_s30, [#allocation9]  }
 0x1d3   :  { %508 = dma.done.wait [#allocation4], 64  }
 0x1d4   :  { %509 = vsyncadd [#allocation4], 4294967232 }
 0x1d5   :  { %510 = dma.done.wait [#allocation9], 64  }
 0x1d6   :  { %511 = vsyncadd [#allocation9], 4294967232 }
 0x1d7   :  { %390 = vsyncpa [#allocation3], 1 }
 0x1d8   :  { %391 = vsyncpa [#allocation6], 1 }
 0x1d9   :  { %392 = vsyncpa [#allocation4], 1 }
 0x1da   :  { %393 = vsyncpa [#allocation9], 1 }

</bundles_post_ra>
